<compile_context>
chip_gen: v7x
topology: tpu7x:2x2x1
jax: 0.10.0
libtpu: 0.0.40
codegen_flags: <defaults>
</compile_context>

<pallas_src>
import functools

import jax
import jax.numpy as jnp
from jax import lax
from jax.experimental import pallas as pl
from jax.experimental.pallas import tpu as pltpu


def _gml_tile_kernel(gt_ref, pr_ref, out_ref, carry_gt_ref, carry_e_ref, *, total_h):
    h_idx = pl.program_id(1)

    # Native-dtype load, f32 compute.
    gt = gt_ref[...].astype(jnp.float32)   # (bh, W)
    pr = pr_ref[...].astype(jnp.float32)
    bh, w = gt.shape

    # Shared difference: gt_dx - pred_dx == roll(e) - e with e = gt - pred
    # (likewise for dy).  Validity masks still come from gt-only gradients.
    e = gt - pr

    # Broadcast-shaped iotas (no full-tile i32 materialization).
    lane = lax.broadcasted_iota(jnp.int32, (1, w), 1)      # (1, W)
    row = lax.broadcasted_iota(jnp.int32, (bh, 1), 0)      # (bh, 1)
    grow = row + h_idx * bh                                 # global row index
    row_in_image = grow < total_h                           # masks padded tail rows

    # ---- horizontal gradient: dx[i, j] = x[i, j+1] - x[i, j] ----------------
    # roll(x, w-1, axis=1)[i, j] == x[i, (j+1) % w]; the wrapped last lane is
    # masked out below.
    gt_dx = pltpu.roll(gt, shift=w - 1, axis=1) - gt
    e_dx = pltpu.roll(e, shift=w - 1, axis=1) - e
    mask_dx = jnp.logical_and(
        jnp.logical_and(jnp.isfinite(gt_dx), lane < (w - 1)), row_in_image)
    sum_dx = jnp.sum(jnp.where(mask_dx, jnp.abs(e_dx), 0.0))
    cnt_dx = jnp.sum(mask_dx.astype(jnp.float32))

    # ---- vertical gradient inside the tile: dy[i, j] = x[i+1, j] - x[i, j] --
    gt_dy = pltpu.roll(gt, shift=bh - 1, axis=0) - gt
    e_dy = pltpu.roll(e, shift=bh - 1, axis=0) - e
    dy_row_ok = jnp.logical_and(row < (bh - 1), grow < (total_h - 1))   # (bh, 1)
    mask_dy = jnp.logical_and(jnp.isfinite(gt_dy), dy_row_ok)
    sum_dy = jnp.sum(jnp.where(mask_dy, jnp.abs(e_dy), 0.0))
    cnt_dy = jnp.sum(mask_dy.astype(jnp.float32))

    # ---- dy seam: previous H tile's last row -> this tile's row 0 -----------
    # The carried row is stale/uninitialized at h_idx == 0 (and across batch
    # boundaries), but the `h_idx > 0` term zeroes its contribution there.
    seam_gt_dy = gt[0:1, :] - carry_gt_ref[...]
    seam_e_dy = e[0:1, :] - carry_e_ref[...]
    seam_mask = jnp.logical_and(jnp.isfinite(seam_gt_dy), h_idx > 0)
    sum_dy = sum_dy + jnp.sum(jnp.where(seam_mask, jnp.abs(seam_e_dy), 0.0))
    cnt_dy = cnt_dy + jnp.sum(seam_mask.astype(jnp.float32))

    # Carry this tile's last row for the next H tile of the same batch element
    # (H axis is "arbitrary", so tiles of one batch element run in order).
    carry_gt_ref[...] = gt[bh - 1:bh, :]
    carry_e_ref[...] = e[bh - 1:bh, :]

    # ---- accumulate into the resident per-batch output tile -----------------
    # Rows 0..3 hold sum_dx, cnt_dx, sum_dy, cnt_dy (replicated across lanes);
    # out_spec ignores h, so the tile stays in VMEM until n changes and is
    # written back to HBM once per batch element.
    slot = lax.broadcasted_iota(jnp.int32, (8, 128), 0)
    part = (jnp.where(slot == 0, sum_dx, 0.0)
            + jnp.where(slot == 1, cnt_dx, 0.0)
            + jnp.where(slot == 2, sum_dy, 0.0)
            + jnp.where(slot == 3, cnt_dy, 0.0))

    @pl.when(h_idx == 0)
    def _():
        out_ref[...] = part

    @pl.when(h_idx > 0)
    def _():
        out_ref[...] += part


def _choose_block_h(H, W, target_f32_tile_bytes=4 * 1024 * 1024):
    """Largest multiple-of-8 row count whose f32 (bh, W) tile is <= target."""
    rows_cap = max(8, (target_f32_tile_bytes // max(W * 4, 1)) // 8 * 8)
    h_rounded = ((H + 7) // 8) * 8
    return int(min(h_rounded, rows_cap))


def gradient_matching_loss(disparity_map_gt, disparity_map_pred, *, block_h=None):
    assert disparity_map_gt.ndim == 4
    assert disparity_map_gt.shape == disparity_map_pred.shape
    N, C, H, W = disparity_map_gt.shape
    # The PyTorch conv2d kernels are (1, 1, kH, kW) -> single input channel.
    assert C == 1, "GradientMatchingLoss requires a single-channel disparity map"

    # Native dtype straight into the kernel (no wrapper astype / extra HBM copy).
    gt = disparity_map_gt.reshape(N, H, W)
    pr = disparity_map_pred.reshape(N, H, W)
    itemsize = jnp.dtype(gt.dtype).itemsize

    if block_h is None:
        block_h = _choose_block_h(H, W)
    assert block_h % 8 == 0 and block_h >= 8, "block_h must be a positive multiple of 8"
    bh = block_h
    n_h_tiles = pl.cdiv(H, bh)   # tail tile (if any) is row-masked in-kernel

    in_spec = pl.BlockSpec((None, bh, W), lambda n, h: (n, h, 0))
    out_spec = pl.BlockSpec((None, 8, 128), lambda n, h: (n, 0, 0))

    flops = 20 * N * H * W
    bytes_accessed = 2 * N * H * W * itemsize + N * 8 * 128 * 4

    kernel = functools.partial(_gml_tile_kernel, total_h=H)

    partials = pl.pallas_call(
        kernel,
        out_shape=jax.ShapeDtypeStruct((N, 8, 128), jnp.float32),
        grid=(N, n_h_tiles),
        in_specs=[in_spec, in_spec],
        out_specs=out_spec,
        scratch_shapes=[
            pltpu.VMEM((1, W), jnp.float32),   # carried gt last row (dy seam)
            pltpu.VMEM((1, W), jnp.float32),   # carried (gt - pred) last row
        ],
        compiler_params=pltpu.CompilerParams(
            # Batch axis is megacore-shardable (v7x).  H MUST stay "arbitrary":
            # the dy seam carry and the resident-output accumulation require
            # sequential H tiles per batch element on one core.
            dimension_semantics=("parallel", "arbitrary"),
            # ~4 MiB f32 tiles, double-buffered pair of inputs + temporaries
            # stay comfortably under this; 48 MiB leaves headroom on v7x
            # (64 MiB physical) and is far below v5e/v6e's 128 MiB.
            vmem_limit_bytes=48 * 1024 * 1024,
        ),
        cost_estimate=pl.CostEstimate(
            flops=flops, transcendentals=0, bytes_accessed=bytes_accessed),
    )(gt, pr)

    # Finalize in plain JAX: rows 0..3 (lane 0) of each per-batch partial tile
    # are [sum_dx, cnt_dx, sum_dy, cnt_dy].
    totals = jnp.sum(partials[:, :4, 0], axis=0)   # (4,)
    # Note: a zero count yields NaN/Inf exactly like the PyTorch module
    # (no extra guard, to preserve its forward semantics).
    return 0.5 * (totals[0] / totals[1] + totals[2] / totals[3])


def _reference(gt, pred):
    gt = gt.astype(jnp.float32)
    pred = pred.astype(jnp.float32)
    gt_dx = gt[..., 1:] - gt[..., :-1]
    pr_dx = pred[..., 1:] - pred[..., :-1]
    gt_dy = gt[..., 1:, :] - gt[..., :-1, :]
    pr_dy = pred[..., 1:, :] - pred[..., :-1, :]
    m_dx = jnp.isfinite(gt_dx)
    m_dy = jnp.isfinite(gt_dy)
    l_dx = jnp.where(m_dx, jnp.abs(gt_dx - pr_dx), 0.0)
    l_dy = jnp.where(m_dy, jnp.abs(gt_dy - pr_dy), 0.0)
    return (jnp.sum(l_dx) / jnp.sum(m_dx).astype(jnp.float32)
            + jnp.sum(l_dy) / jnp.sum(m_dy).astype(jnp.float32)) / 2.0


if __name__ == "__main__":
    key = jax.random.PRNGKey(0)
    k1, k2, k3, k4 = jax.random.split(key, 4)

    # Case 1: default tile sizing -> a single H tile per batch element.
    N, C, H, W = 2, 1, 16, 128
    gt1 = jax.random.normal(k1, (N, C, H, W), dtype=jnp.float32)
    pr1 = jax.random.normal(k2, (N, C, H, W), dtype=jnp.float32)
    # Non-finite GT pixels exercise the isfinite masks.
    gt1 = gt1.at[0, 0, 3, 5].set(jnp.inf)
    gt1 = gt1.at[1, 0, 8, 64].set(jnp.nan)
    loss1 = jax.block_until_ready(gradient_matching_loss(gt1, pr1))
    ref1 = jax.block_until_ready(_reference(gt1, pr1))
    assert jnp.isfinite(ref1), ref1
    assert jnp.allclose(loss1, ref1, rtol=1e-5, atol=1e-6), (loss1, ref1)

    # Case 2: H not a multiple of the block -> exercises H tiling, the dy seam
    # carry between tiles, and the masked padded tail tile (H=20, bh=8 -> 3 tiles).
    N2, H2, W2 = 2, 20, 128
    gt2 = jax.random.normal(k3, (N2, 1, H2, W2), dtype=jnp.float32)
    pr2 = jax.random.normal(k4, (N2, 1, H2, W2), dtype=jnp.float32)
    gt2 = gt2.at[0, 0, 7, 17].set(jnp.inf)    # last row of tile 0 (seam row)
    gt2 = gt2.at[1, 0, 8, 100].set(jnp.nan)   # first row of tile 1 (seam row)
    gt2 = gt2.at[0, 0, 19, 3].set(jnp.inf)    # last valid row (inside tail tile)
    loss2 = jax.block_until_ready(gradient_matching_loss(gt2, pr2, block_h=8))
    ref2 = jax.block_until_ready(_reference(gt2, pr2))
    assert jnp.isfinite(ref2), ref2
    assert jnp.allclose(loss2, ref2, rtol=1e-5, atol=1e-6), (loss2, ref2)

    print("KERNEL_OK")
</pallas_src>

<mosaic_0001>
module attributes {stable_mosaic.version = 11 : i64} {
  func.func @_gml_tile_kernel(%arg0: i32, %arg1: i32, %arg2: memref<1x16x128xf32, #tpu.memory_space<vmem>>, %arg3: memref<1x16x128xf32, #tpu.memory_space<vmem>>, %arg4: memref<1x8x128xf32, #tpu.memory_space<vmem>>, %arg5: memref<1x128xf32, #tpu.memory_space<vmem>>, %arg6: memref<1x128xf32, #tpu.memory_space<vmem>>) attributes {dimension_semantics = [#tpu.dimension_semantics<parallel>, #tpu.dimension_semantics<arbitrary>], iteration_bounds = array<i64: 2, 1>, scalar_prefetch = 0 : i64, scratch_operands = 2 : i64, tpu.core_type = #tpu.core_type<tc>, window_params = [{transform_indices = @transform_0, window_bounds = array<i64: 1, 16, 128>}, {transform_indices = @transform_1, window_bounds = array<i64: 1, 16, 128>}, {transform_indices = @transform_2, window_bounds = array<i64: 1, 8, 128>}]} {
    %c0 = arith.constant 0 : index
    %c0_0 = arith.constant 0 : index
    %c0_1 = arith.constant 0 : index
    %0 = vector.load %arg2[%c0, %c0_0, %c0_1] : memref<1x16x128xf32, #tpu.memory_space<vmem>>, vector<1x16x128xf32>
    %1 = vector.shape_cast %0 : vector<1x16x128xf32> to vector<16x128xf32>
    %c0_2 = arith.constant 0 : index
    %c0_3 = arith.constant 0 : index
    %c0_4 = arith.constant 0 : index
    %2 = vector.load %arg3[%c0_2, %c0_3, %c0_4] : memref<1x16x128xf32, #tpu.memory_space<vmem>>, vector<1x16x128xf32>
    %3 = vector.shape_cast %2 : vector<1x16x128xf32> to vector<16x128xf32>
    %4 = arith.subf %1, %3 : vector<16x128xf32>
    %5 = tpu.iota {dimensions = array<i32: 1>} : vector<1x128xi32>
    %6 = tpu.iota {dimensions = array<i32: 0>} : vector<16x1xi32>
    %c16_i32 = arith.constant 16 : i32
    %7 = arith.muli %arg1, %c16_i32 : i32
    %8 = vector.broadcast %7 : i32 to vector<16x1xi32>
    %9 = arith.addi %6, %8 : vector<16x1xi32>
    %c16_i32_5 = arith.constant 16 : i32
    %10 = vector.broadcast %c16_i32_5 : i32 to vector<16x1xi32>
    %11 = arith.cmpi slt, %9, %10 : vector<16x1xi32>
    %c127_i32 = arith.constant 127 : i32
    %12 = tpu.dynamic_rotate %1 by %c127_i32 dim 1 : vector<16x128xf32>, i32 -> vector<16x128xf32>
    %13 = arith.subf %12, %1 : vector<16x128xf32>
    %c127_i32_6 = arith.constant 127 : i32
    %14 = tpu.dynamic_rotate %4 by %c127_i32_6 dim 1 : vector<16x128xf32>, i32 -> vector<16x128xf32>
    %15 = arith.subf %14, %4 : vector<16x128xf32>
    %16 = tpu.weird %13 : vector<16x128xf32> -> vector<16x128xi1>
    %cst = arith.constant dense<true> : vector<16x128xi1>
    %17 = arith.xori %16, %cst : vector<16x128xi1>
    %c127_i32_7 = arith.constant 127 : i32
    %18 = vector.broadcast %c127_i32_7 : i32 to vector<1x128xi32>
    %19 = arith.cmpi slt, %5, %18 : vector<1x128xi32>
    %20 = vector.broadcast %19 : vector<1x128xi1> to vector<16x128xi1>
    %21 = arith.andi %17, %20 : vector<16x128xi1>
    %22 = vector.broadcast %11 : vector<16x1xi1> to vector<16x128xi1>
    %23 = arith.andi %21, %22 : vector<16x128xi1>
    %24 = math.absf %15 : vector<16x128xf32>
    %cst_8 = arith.constant 0.000000e+00 : f32
    %25 = vector.broadcast %cst_8 : f32 to vector<16x128xf32>
    %26 = arith.select %23, %24, %25 : vector<16x128xi1>, vector<16x128xf32>
    %27 = vector.shape_cast %26 : vector<16x128xf32> to vector<1x16x128xf32>
    %cst_9 = arith.constant dense<0.000000e+00> : vector<1xf32>
    %28 = vector.multi_reduction <add>, %27, %cst_9 [1, 2] : vector<1x16x128xf32> to vector<1xf32>
    %29 = vector.shape_cast %28 : vector<1xf32> to vector<1x1x1xf32>
    %30 = vector.extract %29[0, 0, 0] : f32 from vector<1x1x1xf32>
    %31 = arith.extui %23 : vector<16x128xi1> to vector<16x128xi32>
    %32 = arith.sitofp %31 : vector<16x128xi32> to vector<16x128xf32>
    %33 = vector.shape_cast %32 : vector<16x128xf32> to vector<1x16x128xf32>
    %cst_10 = arith.constant dense<0.000000e+00> : vector<1xf32>
    %34 = vector.multi_reduction <add>, %33, %cst_10 [1, 2] : vector<1x16x128xf32> to vector<1xf32>
    %35 = vector.shape_cast %34 : vector<1xf32> to vector<1x1x1xf32>
    %36 = vector.extract %35[0, 0, 0] : f32 from vector<1x1x1xf32>
    %c15_i32 = arith.constant 15 : i32
    %37 = tpu.dynamic_rotate %1 by %c15_i32 dim 0 : vector<16x128xf32>, i32 -> vector<16x128xf32>
    %38 = arith.subf %37, %1 : vector<16x128xf32>
    %c15_i32_11 = arith.constant 15 : i32
    %39 = tpu.dynamic_rotate %4 by %c15_i32_11 dim 0 : vector<16x128xf32>, i32 -> vector<16x128xf32>
    %40 = arith.subf %39, %4 : vector<16x128xf32>
    %c15_i32_12 = arith.constant 15 : i32
    %41 = vector.broadcast %c15_i32_12 : i32 to vector<16x1xi32>
    %42 = arith.cmpi slt, %6, %41 : vector<16x1xi32>
    %c15_i32_13 = arith.constant 15 : i32
    %43 = vector.broadcast %c15_i32_13 : i32 to vector<16x1xi32>
    %44 = arith.cmpi slt, %9, %43 : vector<16x1xi32>
    %45 = arith.andi %42, %44 : vector<16x1xi1>
    %46 = tpu.weird %38 : vector<16x128xf32> -> vector<16x128xi1>
    %cst_14 = arith.constant dense<true> : vector<16x128xi1>
    %47 = arith.xori %46, %cst_14 : vector<16x128xi1>
    %48 = vector.broadcast %45 : vector<16x1xi1> to vector<16x128xi1>
    %49 = arith.andi %47, %48 : vector<16x128xi1>
    %50 = math.absf %40 : vector<16x128xf32>
    %cst_15 = arith.constant 0.000000e+00 : f32
    %51 = vector.broadcast %cst_15 : f32 to vector<16x128xf32>
    %52 = arith.select %49, %50, %51 : vector<16x128xi1>, vector<16x128xf32>
    %53 = vector.shape_cast %52 : vector<16x128xf32> to vector<1x16x128xf32>
    %cst_16 = arith.constant dense<0.000000e+00> : vector<1xf32>
    %54 = vector.multi_reduction <add>, %53, %cst_16 [1, 2] : vector<1x16x128xf32> to vector<1xf32>
    %55 = vector.shape_cast %54 : vector<1xf32> to vector<1x1x1xf32>
    %56 = vector.extract %55[0, 0, 0] : f32 from vector<1x1x1xf32>
    %57 = arith.extui %49 : vector<16x128xi1> to vector<16x128xi32>
    %58 = arith.sitofp %57 : vector<16x128xi32> to vector<16x128xf32>
    %59 = vector.shape_cast %58 : vector<16x128xf32> to vector<1x16x128xf32>
    %cst_17 = arith.constant dense<0.000000e+00> : vector<1xf32>
    %60 = vector.multi_reduction <add>, %59, %cst_17 [1, 2] : vector<1x16x128xf32> to vector<1xf32>
    %61 = vector.shape_cast %60 : vector<1xf32> to vector<1x1x1xf32>
    %62 = vector.extract %61[0, 0, 0] : f32 from vector<1x1x1xf32>
    %63 = vector.extract_strided_slice %1 {offsets = [0, 0], sizes = [1, 128], strides = [1, 1]} : vector<16x128xf32> to vector<1x128xf32>
    %c0_18 = arith.constant 0 : index
    %c0_19 = arith.constant 0 : index
    %64 = vector.load %arg5[%c0_18, %c0_19] : memref<1x128xf32, #tpu.memory_space<vmem>>, vector<1x128xf32>
    %65 = arith.subf %63, %64 : vector<1x128xf32>
    %66 = vector.extract_strided_slice %4 {offsets = [0, 0], sizes = [1, 128], strides = [1, 1]} : vector<16x128xf32> to vector<1x128xf32>
    %c0_20 = arith.constant 0 : index
    %c0_21 = arith.constant 0 : index
    %67 = vector.load %arg6[%c0_20, %c0_21] : memref<1x128xf32, #tpu.memory_space<vmem>>, vector<1x128xf32>
    %68 = arith.subf %66, %67 : vector<1x128xf32>
    %69 = tpu.weird %65 : vector<1x128xf32> -> vector<1x128xi1>
    %cst_22 = arith.constant dense<true> : vector<1x128xi1>
    %70 = arith.xori %69, %cst_22 : vector<1x128xi1>
    %c0_i32 = arith.constant 0 : i32
    %71 = arith.cmpi sgt, %arg1, %c0_i32 : i32
    %72 = vector.broadcast %71 : i1 to vector<1x128xi1>
    %73 = arith.andi %70, %72 : vector<1x128xi1>
    %74 = math.absf %68 : vector<1x128xf32>
    %cst_23 = arith.constant 0.000000e+00 : f32
    %75 = vector.broadcast %cst_23 : f32 to vector<1x128xf32>
    %76 = arith.select %73, %74, %75 : vector<1x128xi1>, vector<1x128xf32>
    %77 = vector.shape_cast %76 : vector<1x128xf32> to vector<1x1x128xf32>
    %cst_24 = arith.constant dense<0.000000e+00> : vector<1xf32>
    %78 = vector.multi_reduction <add>, %77, %cst_24 [1, 2] : vector<1x1x128xf32> to vector<1xf32>
    %79 = vector.shape_cast %78 : vector<1xf32> to vector<1x1x1xf32>
    %80 = vector.extract %79[0, 0, 0] : f32 from vector<1x1x1xf32>
    %81 = arith.addf %56, %80 : f32
    %82 = arith.extui %73 : vector<1x128xi1> to vector<1x128xi32>
    %83 = arith.sitofp %82 : vector<1x128xi32> to vector<1x128xf32>
    %84 = vector.shape_cast %83 : vector<1x128xf32> to vector<1x1x128xf32>
    %cst_25 = arith.constant dense<0.000000e+00> : vector<1xf32>
    %85 = vector.multi_reduction <add>, %84, %cst_25 [1, 2] : vector<1x1x128xf32> to vector<1xf32>
    %86 = vector.shape_cast %85 : vector<1xf32> to vector<1x1x1xf32>
    %87 = vector.extract %86[0, 0, 0] : f32 from vector<1x1x1xf32>
    %88 = arith.addf %62, %87 : f32
    %89 = vector.extract_strided_slice %1 {offsets = [15, 0], sizes = [1, 128], strides = [1, 1]} : vector<16x128xf32> to vector<1x128xf32>
    %c0_26 = arith.constant 0 : index
    %c0_27 = arith.constant 0 : index
    %90 = vector.load %arg5[%c0_26, %c0_27] : memref<1x128xf32, #tpu.memory_space<vmem>>, vector<1x128xf32>
    tpu.vector_store %arg5[%c0_26, %c0_27], %89 {strides = array<i32>} : memref<1x128xf32, #tpu.memory_space<vmem>>, vector<1x128xf32>,
    %91 = vector.extract_strided_slice %4 {offsets = [15, 0], sizes = [1, 128], strides = [1, 1]} : vector<16x128xf32> to vector<1x128xf32>
    %c0_28 = arith.constant 0 : index
    %c0_29 = arith.constant 0 : index
    %92 = vector.load %arg6[%c0_28, %c0_29] : memref<1x128xf32, #tpu.memory_space<vmem>>, vector<1x128xf32>
    tpu.vector_store %arg6[%c0_28, %c0_29], %91 {strides = array<i32>} : memref<1x128xf32, #tpu.memory_space<vmem>>, vector<1x128xf32>,
    %93 = tpu.iota {dimensions = array<i32: 0>} : vector<8x128xi32>
    %c0_i32_30 = arith.constant 0 : i32
    %94 = vector.broadcast %c0_i32_30 : i32 to vector<8x128xi32>
    %95 = arith.cmpi eq, %93, %94 : vector<8x128xi32>
    %cst_31 = arith.constant 0.000000e+00 : f32
    %96 = vector.broadcast %30 : f32 to vector<8x128xf32>
    %97 = vector.broadcast %cst_31 : f32 to vector<8x128xf32>
    %98 = arith.select %95, %96, %97 : vector<8x128xi1>, vector<8x128xf32>
    %c1_i32 = arith.constant 1 : i32
    %99 = vector.broadcast %c1_i32 : i32 to vector<8x128xi32>
    %100 = arith.cmpi eq, %93, %99 : vector<8x128xi32>
    %cst_32 = arith.constant 0.000000e+00 : f32
    %101 = vector.broadcast %36 : f32 to vector<8x128xf32>
    %102 = vector.broadcast %cst_32 : f32 to vector<8x128xf32>
    %103 = arith.select %100, %101, %102 : vector<8x128xi1>, vector<8x128xf32>
    %104 = arith.addf %98, %103 : vector<8x128xf32>
    %c2_i32 = arith.constant 2 : i32
    %105 = vector.broadcast %c2_i32 : i32 to vector<8x128xi32>
    %106 = arith.cmpi eq, %93, %105 : vector<8x128xi32>
    %cst_33 = arith.constant 0.000000e+00 : f32
    %107 = vector.broadcast %81 : f32 to vector<8x128xf32>
    %108 = vector.broadcast %cst_33 : f32 to vector<8x128xf32>
    %109 = arith.select %106, %107, %108 : vector<8x128xi1>, vector<8x128xf32>
    %110 = arith.addf %104, %109 : vector<8x128xf32>
    %c3_i32 = arith.constant 3 : i32
    %111 = vector.broadcast %c3_i32 : i32 to vector<8x128xi32>
    %112 = arith.cmpi eq, %93, %111 : vector<8x128xi32>
    %cst_34 = arith.constant 0.000000e+00 : f32
    %113 = vector.broadcast %88 : f32 to vector<8x128xf32>
    %114 = vector.broadcast %cst_34 : f32 to vector<8x128xf32>
    %115 = arith.select %112, %113, %114 : vector<8x128xi1>, vector<8x128xf32>
    %116 = arith.addf %110, %115 : vector<8x128xf32>
    %c0_i32_35 = arith.constant 0 : i32
    %117 = arith.cmpi eq, %arg1, %c0_i32_35 : i32
    %118 = arith.extui %117 : i1 to i32
    %c0_i32_36 = arith.constant 0 : i32
    %119 = arith.cmpi ne, %118, %c0_i32_36 : i32
    scf.if %119 {
      %c0_39 = arith.constant 0 : index
      %c0_40 = arith.constant 0 : index
      %c0_41 = arith.constant 0 : index
      %123 = vector.load %arg4[%c0_39, %c0_40, %c0_41] : memref<1x8x128xf32, #tpu.memory_space<vmem>>, vector<1x8x128xf32>
      %124 = vector.shape_cast %123 : vector<1x8x128xf32> to vector<8x128xf32>
      %125 = vector.shape_cast %116 : vector<8x128xf32> to vector<1x8x128xf32>
      tpu.vector_store %arg4[%c0_39, %c0_40, %c0_41], %125 {strides = array<i32>} : memref<1x8x128xf32, #tpu.memory_space<vmem>>, vector<1x8x128xf32>,
    } else {
    }
    %c0_i32_37 = arith.constant 0 : i32
    %120 = arith.cmpi sgt, %arg1, %c0_i32_37 : i32
    %121 = arith.extui %120 : i1 to i32
    %c0_i32_38 = arith.constant 0 : i32
    %122 = arith.cmpi ne, %121, %c0_i32_38 : i32
    scf.if %122 {
      %c0_39 = arith.constant 0 : index
      %c0_40 = arith.constant 0 : index
      %c0_41 = arith.constant 0 : index
      %123 = vector.load %arg4[%c0_39, %c0_40, %c0_41] : memref<1x8x128xf32, #tpu.memory_space<vmem>>, vector<1x8x128xf32>
      %124 = vector.shape_cast %123 : vector<1x8x128xf32> to vector<8x128xf32>
      %125 = arith.addf %124, %116 : vector<8x128xf32>
      %c0_42 = arith.constant 0 : index
      %c0_43 = arith.constant 0 : index
      %c0_44 = arith.constant 0 : index
      %126 = vector.load %arg4[%c0_42, %c0_43, %c0_44] : memref<1x8x128xf32, #tpu.memory_space<vmem>>, vector<1x8x128xf32>
      %127 = vector.shape_cast %126 : vector<1x8x128xf32> to vector<8x128xf32>
      %128 = vector.shape_cast %125 : vector<8x128xf32> to vector<1x8x128xf32>
      tpu.vector_store %arg4[%c0_42, %c0_43, %c0_44], %128 {strides = array<i32>} : memref<1x8x128xf32, #tpu.memory_space<vmem>>, vector<1x8x128xf32>,
    } else {
    }
    return
  }
  func.func @transform_0(%arg0: i32, %arg1: i32) -> (i32, i32, i32) {
    %c0_i32 = arith.constant 0 : i32
    %c0_i32_0 = arith.constant 0 : i32
    return %arg0, %arg1, %c0_i32 : i32, i32, i32
  }
  func.func @transform_1(%arg0: i32, %arg1: i32) -> (i32, i32, i32) {
    %c0_i32 = arith.constant 0 : i32
    %c0_i32_0 = arith.constant 0 : i32
    return %arg0, %arg1, %c0_i32 : i32, i32, i32
  }
  func.func @transform_2(%arg0: i32, %arg1: i32) -> (i32, i32, i32) {
    %c0_i32 = arith.constant 0 : i32
    %c0_i32_0 = arith.constant 0 : i32
    %c0_i32_1 = arith.constant 0 : i32
    return %arg0, %c0_i32, %c0_i32_0 : i32, i32, i32
  }
}

</mosaic_0001>

<bundles_post_ra>
// kernel: tpu_custom_call.1
= control target key start
LH: loop header
LB: loop body
LE: loop exit
PB: predicated region body
PF: predicated region fallthrough
CT: control target
= control target key end

     0   :  { %7 = vsyncpa [#allocation5], 0  ;;  %s1072_s0 = inlined_call_operand.hbm [shape: f32[2,16,128], index: 0, kind: input, shape index: {}]   ;;  %s1073_s1 = inlined_call_operand.hbm [shape: f32[2,16,128], index: 1, kind: input, shape index: {}]   ;;  %s1074_s2 = inlined_call_operand.hbm [shape: f32[2,8,128], index: 2, kind: output, shape index: {}]  }
   0x1   :  { %9 = vsyncpa [#allocation5 + $0x1], 0 }
   0x2   :  { %10 = vsyncpa [#allocation8], 0 }
   0x3   :  { %12 = vsyncpa [#allocation8 + $0x1], 0 }
   0x4   :  { %13 = vsyncpa [#allocation6], 0 }
   0x5   :  { %15 = vsyncpa [#allocation6 + $0x1], 0  ;;  %s819_s9 = smov 0   ;;  %s821_s10 = smov 0  }
   0x6   :  { %s823_s11 = smov 0   ;;  %s825_s12 = smov 0  }
   0x7   :  { %s827_s13 = smov 0   ;;  %s829_s14 = smov 0  }
   0x8 LB: > { %s540_s15 = sadd.s32 4294967295, %s794_s14   ;;  %s541_s16 = sadd.s32 4294967294, %s794_s14   ;;  %s794_s14 = sphi %s829_s14, %s21_s14   ;;  %s790_s13 = sphi %s827_s13, %s1094_s13   ;;  %s786_s12 = sphi %s825_s12, %s1093_s12   ;;  %s782_s11 = sphi %s823_s11, %s1092_s11   ;;  %s778_s10 = sphi %s821_s10, %s1091_s10   ;;  %s774_s9 = sphi %s819_s9, %s1090_s9  }
   0x9   : > { %s33_s17 = sadd.s32 1, %s790_s13  ;;  %s42_s18 = sadd.s32 1, %s782_s11 }
   0xa   : > { %p35_p0 = scmp.ge.s32.totalorder %s33_s17, 2  ;;  %p49_p1 = scmp.ne.s32.totalorder %s782_s11, %s778_s10 }
   0xb   : > { %p50_p2 = scmp.eq.s32.totalorder %s794_s14, 0  ;;  %p55_p3 = scmp.ne.s32.totalorder %s778_s10, %s774_s9 }
   0xc   : > { %s1096_s17 = smov (%p35_p0, %s33_s17), 0  ;;  %p56_p5 = scmp.eq.s32.totalorder %s540_s15, 0 }
   0xd   : > { %p860_p4 = por %p50_p2, %p49_p1  ;;  %s37_s20 = ssub.s32 %s790_s13, %s1096_s17 }
   0xe   : > { %p107_p6 = scmp.eq.s32.totalorder %s540_s15, 1  ;;  %p40_p7 = scmp.eq.s32.totalorder %s37_s20, 0 }
   0xf   : > { %p866_p8 = por %p56_p5, %p55_p3  ;;  %p113_p10 = scmp.eq.s32.totalorder %s541_s16, 1 }
  0x10   : > { %p870_p9 = por %p107_p6, %p49_p1  ;;  %p593_p13 = scmp.lt.s32.totalorder %s794_s14, 2 }
  0x11   : > { %s1078_s21 = scalar_select %p866_p8, 1, 0 }
  0x12   : > { %s1079_s22 = scalar_select %p870_p9, 1, 0 }
  0x13   : > { %s875_s23 = scalar_select %p40_p7, %s782_s11, %s42_s18  }
  0x14   : > { %p877_p11 = por %p113_p10, %p55_p3  ;;  %s884_s25 = sand.u32 1, %s782_s11  }
  0x15   : > { %s544_s26 = sshll.u32 %s884_s25, 4  ;;  %s562_s27 = sshll.u32 %s790_s13, 8 }
  0x16   : > { %s1080_s24 = scalar_select %p877_p11, 1, 0 }
  0x17   : > { %s893_s30 = scalar_lea.hbm %s1072_s0, %s562_s27  ;;  %s137_s3 = scalar_lea.vmem [#allocation4], %s544_s26 }
  0x18   : > { %s146_s4 = sshll.u32 %s137_s3, 4  ;;  %p901_p0 = pnand %p593_p13, %p860_p4  ;;  %s897_s4 = int_to_ptr.vmem [resolvable:$true] %s146_s4 }
  0x19   : > { %s134_s6 = scalar_lea.sflag [#allocation5], %s884_s25  ;;  %s648_s7 = scalar_lea.hbm %s893_s30, 256 }
  0x1a   : > { %p649_p2 = scmp.ne.s32.totalorder %s893_s30, %s648_s7  ;;  %p650_p3 = pneg %p901_p0 }
  0x1b   : > { %s653_s16 = scalar_lea.hbm %s1072_s0, 512  ;;  %p654_p4 = scmp.lt.u32.totalorder %s893_s30, %s1072_s0 }
  0x1c   : > { %p651_p5 = pnand %p650_p3, %p649_p2  ;;  %p655_p7 = scmp.lt.u32.totalorder %s653_s16, %s648_s7 }
  0x1d   : > { %p657_p13 = scmp.lt.u32.totalorder %s648_s7, %s893_s30 }
  0x1e   : > { %p652_p6 = pneg %p651_p5  ;;  %p656_p10 = por %p655_p7, %p654_p4 }
  0x20   : > { %p658_p12 = por %p657_p13, %p656_p10 }
  0x22   : > { %p659_p1 = pnand %p658_p12, %p652_p6 }
  0x24   : > { %662 = shalt.err (!%p659_p1)
}
  0x25   : > { %s663_s20 = scalar_lea.vmem %s897_s4, 256  ;;  %s796_s28 = smov [#allocation4]  }
  0x26   : > { %p664_p2 = scmp.ne.s32.totalorder %s897_s4, %s663_s20  ;;  %s668_s29 = sshll.u32 %s796_s28, 4  ;;  %s669_s29 = int_to_ptr.vmem [resolvable:$false] %s668_s29 }
  0x27   : > { %s670_s3 = scalar_lea.vmem %s669_s29, 512  ;;  %p671_p9 = scmp.lt.s32.totalorder %s897_s4, %s669_s29 }
  0x28   : > { %p666_p5 = pnand %p664_p2, %p650_p3  ;;  %p672_p4 = scmp.lt.s32.totalorder %s670_s3, %s663_s20 }
  0x2a   : > { %p667_p11 = pneg %p666_p5  ;;  %p673_p7 = por %p672_p4, %p671_p9 }
  0x2c   : > { %p674_p10 = pnand %p673_p7, %p667_p11 }
  0x2e   : > { %677 = shalt.err (!%p674_p10)
}
  0x2f   : > { %s797_s7 = smov 128   ;;  %s798_s8 = smov 8  }
  0x30   : > { %585 = dma.hbm_to_vmem [thread:$0]  (!%p901_p0), %s893_s30, 256, %s897_s4, %s134_s6, %s797_s7, %s797_s7, %s798_s8  }
  0x31   : > { %p177_p9 = scmp.lt.s32.totalorder %s794_s14, 3  ;;  %s943_s18 = scalar_lea.hbm %s1073_s1, %s562_s27 }
  0x32   : > { %p1082_p11 = scmp.ge.s32.totalorder %s794_s14, 1  ;;  %s160_s20 = scalar_lea.vmem [#allocation7], %s544_s26 }
  0x33   : > { %s169_s28 = sshll.u32 %s160_s20, 4  ;;  %s157_s30 = scalar_lea.sflag [#allocation8], %s884_s25  ;;  %s953_s28 = int_to_ptr.vmem [resolvable:$true] %s169_s28 }
  0x34   : > { %p947_p12 = pnand %p1082_p11, %p177_p9  ;;  %s678_s4 = scalar_lea.hbm %s943_s18, 256 }
  0x35   : > { %p679_p1 = scmp.ne.s32.totalorder %s943_s18, %s678_s4  ;;  %s683_s29 = scalar_lea.hbm %s1073_s1, 512 }
  0x36   : > { %p684_p2 = scmp.lt.u32.totalorder %s943_s18, %s1073_s1  ;;  %p685_p5 = scmp.lt.u32.totalorder %s683_s29, %s678_s4 }
  0x37   : > { %p681_p6 = pnand %p679_p1, %p650_p3  ;;  %p687_p7 = scmp.lt.u32.totalorder %s678_s4, %s943_s18 }
  0x38   : > { %p686_p4 = por %p685_p5, %p684_p2 }
  0x39   : > { %p682_p13 = pneg %p681_p6 }
  0x3a   : > { %p688_p10 = por %p687_p7, %p686_p4 }
  0x3c   : > { %p689_p9 = pnand %p688_p10, %p682_p13 }
  0x3e   : > { %692 = shalt.err (!%p689_p9)
}
  0x3f   : > { %s693_s26 = scalar_lea.vmem %s953_s28, 256  ;;  %s799_s16 = smov [#allocation7]  }
  0x40   : > { %p694_p11 = scmp.ne.s32.totalorder %s953_s28, %s693_s26  ;;  %s698_s20 = sshll.u32 %s799_s16, 4  ;;  %s699_s20 = int_to_ptr.vmem [resolvable:$false] %s698_s20 }
  0x41   : > { %s700_s27 = scalar_lea.vmem %s699_s20, 512  ;;  %p701_p8 = scmp.lt.s32.totalorder %s953_s28, %s699_s20 }
  0x42   : > { %p696_p1 = pnand %p694_p11, %p650_p3  ;;  %p702_p2 = scmp.lt.s32.totalorder %s700_s27, %s693_s26 }
  0x44   : > { %p697_p6 = pneg %p696_p1  ;;  %p703_p5 = por %p702_p2, %p701_p8 }
  0x46   : > { %p704_p4 = pnand %p703_p5, %p697_p6 }
  0x48   : > { %707 = shalt.err (!%p704_p4)
}
  0x49   : > { %588 = dma.hbm_to_vmem [thread:$0]  (!%p901_p0), %s943_s18, 256, %s953_s28, %s157_s30, %s797_s7, %s797_s7, %s798_s8  }
  0x4a   : > { %181 = sbr.rel (%p947_p12) target bundleno = 444 (0x1bc), region = 28  ;;  %s987_s4 = sand.u32 (!%p947_p12), 1, %s778_s10  }
  0x4b   : > { %s551_s6 = sshll.u32 (!%p947_p12), %s987_s4, 4  ;;  %s184_s29 = scalar_lea.sflag (!%p947_p12), [#allocation5], %s987_s4 }
  0x4c   : > { %s187_s5 = scalar_lea.vmem (!%p947_p12), [#allocation4], %s551_s6  ;;  %p1084_p8 = scmp.ne.s32.totalorder (!%p947_p12), %s1078_s21, 0 }
  0x51   : > { %761 = dma.done.wait (%p1084_p8), %s184_s29, 256  }
  0x52   : > { %763 = vsyncadd (%p1084_p8), %s184_s29, 4294967040  ;;  %s193_s25 = scalar_lea.sflag [#allocation8], %s987_s4  ;;  %s196_s7 = scalar_lea.vmem [#allocation7], %s551_s6 }
  0x53   : > { %765 = dma.done.wait (%p1084_p8), %s193_s25, 256  }
  0x54   : > { %767 = vsyncadd (%p1084_p8), %s193_s25, 4294967040  ;;  %v224_v0 = vld [vmem:[%s187_s5] sm:$0xff]  ;;  %v225_v2 = vld [vmem:[%s187_s5 + $0x8] sm:$0xff]  ;;  %s800_s8 = smov 127   ;;  %v230_v6 = vlaneseq  ;;  %vm801_vm5 = vmmov 1   ;;  %v802_v22 = vmov 0.0  }
  0x55   : > { %v226_v1 = vld [vmem:[%s196_s7] sm:$0xff]  ;;  %241 = vrot.lane.b32.xlu0 %v224_v0, %s800_s8  ;;  %v227_v4 = vld [vmem:[%s196_s7 + $0x8] sm:$0xff]  ;;  %v296_v8 = vrot.slane %v224_v0, 1  ;;  %v297_v9 = vrot.slane %v225_v2, 1  ;;  %s553_s19 = sshll.u32 %s987_s4, 3  ;;  %s559_s20 = sshll.u32 %s786_s12, 7 }
  0x56   : > { %v228_v3 = vsub.f32 %v224_v0, %v226_v1  ;;  %v229_v5 = vsub.f32 %v225_v2, %v227_v4  ;;  %v1000_v7 = vshrl.u32 %v230_v6, 7  ;;  %v231_v31 = vand.u32 127, %v230_v6  ;;  %s221_s27 = scalar_lea.vmem [#allocation9], %s553_s19  ;;  %s1023_s25 = scalar_lea.hbm %s1074_s2, %s559_s20 }
  0x57   : > { %s433_s6 = sshll.u32 %s221_s27, 4  ;;  %s420_s7 = scalar_lea.sflag [#allocation6], %s987_s4  ;;  %s1025_s6 = int_to_ptr.vmem [resolvable:$true] %s433_s6 }
  0x58   : > { %247 = vrot.lane.b32.xlu1 %v228_v3, %s800_s8  ;;  %vm298_vm0 = vcmp.lt.s32.totalorder %v1000_v7, 7  ;;  %v234_v11 = vadd.s32 8, %v1000_v7  ;;  %v303_v15 = vrot.slane %v228_v3, 1  ;;  %v304_v16 = vrot.slane %v229_v5, 1  ;;  %p1087_p3 = scmp.ne.s32.totalorder %s1079_s22, 0  ;;  %s803_s12 = smov [#allocation9]  }
  0x59   : > { %243 = vrot.lane.b32.xlu0 %v225_v2, %s800_s8  ;;  %v300_v10 = vsel %vm298_vm0, %v297_v9, %v296_v8  ;;  %v299_v12 = vsel %vm298_vm0, %v296_v8, %v297_v9  ;;  %vm257_vm10 = vcmp.lt.s32.totalorder %v231_v31, 127 }
  0x5a   : > { %v302_v13 = vsub.f32 %v300_v10, %v225_v2  ;;  %v301_v14 = vsub.f32 %v299_v12, %v224_v0  ;;  %vm310_vm1 = vcmp.lt.s32.totalorder %v234_v11, 15  ;;  %v305_v18 = vsel %vm298_vm0, %v303_v15, %v304_v16 }
  0x5b   : > { %vm1004_vm3 = vmand %vm310_vm1, %vm310_vm1  ;;  %v306_v19 = vsel %vm298_vm0, %v304_v16, %v303_v15  ;;  %v307_v20 = vsub.f32 %v305_v18, %v228_v3  ;;  %vm393_vm0 = vcmp.eq.s32.totalorder %v1000_v7, 0  ;;  %vm396_vm1 = vcmp.eq.s32.totalorder %v1000_v7, 1 }
  0x5c   : > { %249 = vrot.lane.b32.xlu1 %v229_v5, %s800_s8  ;;  %vm316_vm2 = vweird.f32 %v302_v13  ;;  %vm315_vm4 = vweird.f32 %v301_v14  ;;  %v308_v21 = vsub.f32 %v306_v19, %v229_v5  ;;  %s708_s8 = scalar_lea.vmem %s1025_s6, 128 }
  0x5d   : > { %vm318_vm6 = vmxor %vm316_vm2, %vm801_vm5  ;;  %v325_v25 = vand.u32 2147483647, %v307_v20  ;;  %vm400_vm2 = vcmp.eq.s32.totalorder %v1000_v7, 2  ;;  %p709_p0 = scmp.ne.s32.totalorder %s1025_s6, %s708_s8 }
  0x5e   : > { %vm317_vm7 = vmxor %vm315_vm4, %vm801_vm5  ;;  %v326_v26 = vand.u32 2147483647, %v308_v21 }
  0x5f   : > { %vm324_vm8 = vmand %vm318_vm6, %vm1004_vm3  ;;  %v556_v23 = vsel %vm317_vm7, 1.0, %v802_v22  ;;  %v327_v28 = vsel %vm317_vm7, %v325_v25, 0.0  ;;  %vm404_vm3 = vcmp.eq.s32.totalorder %v1000_v7, 3  ;;  %p710_p12 = pnand %p709_p0, %p1087_p3 }
  0x60   : > { %v557_v24 = vsel %vm324_vm8, 1.0, %v802_v22  ;;  %v328_v29 = vsel %vm324_vm8, %v326_v26, 0.0 }
  0x61   : > { %v343_v27 = vadd.f32 %v557_v24, %v556_v23  ;;  %v329_v30 = vadd.f32 %v328_v29, %v327_v28  ;;  %p711_p13 = pneg %p710_p12 }
  0x78   : > { %344 = vadd.xlane.f32.xlu0 %v343_v27 }
  0x7c   : > { %330 = vadd.xlane.f32.xlu0 %v329_v30 }
  0xc7   : > { %v242_v32 = vpop.permute.xlu0 %241 }
  0xc8   : > { %v245_v33 = vsub.f32 %v242_v32, %v224_v0 }
  0xca   : > { %v248_v34 = vpop.permute.xlu1 %247  ;;  %vm253_vm9 = vweird.f32 %v245_v33 }
  0xcb   : > { %v251_v35 = vsub.f32 %v248_v34, %v228_v3  ;;  %vm255_vm11 = vmxor %vm253_vm9, %vm801_vm5  ;;  %v244_v36 = vpop.permute.xlu0 %243 }
  0xcc   : > { %v246_v37 = vsub.f32 %v244_v36, %v225_v2  ;;  %vm260_vm12 = vmand %vm255_vm11, %vm257_vm10 }
  0xcd   : > { %v268_v39 = vand.u32 2147483647, %v251_v35  ;;  %v554_v42 = vsel %vm260_vm12, 1.0, %v802_v22 }
  0xce   : > { %v250_v38 = vpop.permute.xlu1 %249  ;;  %vm254_vm13 = vweird.f32 %v246_v37 }
  0xcf   : > { %v252_v40 = vsub.f32 %v250_v38, %v229_v5  ;;  %vm256_vm14 = vmxor %vm254_vm13, %vm801_vm5  ;;  %v270_v45 = vsel %vm260_vm12, %v268_v39, 0.0 }
  0xd0   : > { %vm261_vm15 = vmand %vm256_vm14, %vm257_vm10 }
  0xd1   : > { %v269_v41 = vand.u32 2147483647, %v252_v40  ;;  %v555_v43 = vsel %vm261_vm15, 1.0, %v802_v22 }
  0xd2   : > { %v286_v44 = vadd.f32 %v555_v43, %v554_v42 }
  0xd3   : > { %v271_v46 = vsel %vm261_vm15, %v269_v41, 0.0 }
  0xd4   : > { %v272_v47 = vadd.f32 %v271_v46, %v270_v45  ;;  %287 = vadd.xlane.f32.xlu1 %v286_v44 }
  0xd6   : > { %273 = vadd.xlane.f32.xlu0 %v272_v47 }
  0xd8   : > { %368 = vadd.xlane.f32.xlu1 %v802_v22 }
  0xda   : > { %381 = vadd.xlane.f32.xlu0 %v802_v22 }
 0x105   : > { %v345_v48 = vpop.xlane.xlu0 %344 }
 0x106   : > { %v346_v51 = vrot.slane %v345_v48, 4 }
 0x108   : > { %v347_v53 = vadd.f32 %v346_v51, %v345_v48 }
 0x109   : > { %v331_v49 = vpop.xlane.xlu0 %330 }
 0x10a   : > { %v332_v50 = vrot.slane %v331_v49, 4  ;;  %v348_v59 = vrot.slane %v347_v53, 2 }
 0x10c   : > { %v333_v52 = vadd.f32 %v332_v50, %v331_v49  ;;  %v349_v8 = vadd.f32 %v348_v59, %v347_v53 }
 0x10e   : > { %v334_v57 = vrot.slane %v333_v52, 2  ;;  %v350_v18 = vrot.slane %v349_v8, 1 }
 0x110   : > { %v335_v4 = vadd.f32 %v334_v57, %v333_v52  ;;  %v351_v24 = vadd.f32 %v350_v18, %v349_v8 }
 0x112   : > { %v336_v15 = vrot.slane %v335_v4, 1 }
 0x114   : > { %v337_v22 = vadd.f32 %v336_v15, %v335_v4 }
 0x161   : > { %v288_v54 = vpop.xlane.xlu1 %287 }
 0x162   : > { %v289_v55 = vrot.slane %v288_v54, 4 }
 0x163   : > { %v274_v56 = vpop.xlane.xlu0 %273 }
 0x164   : > { %v275_v58 = vrot.slane %v274_v56, 4  ;;  %v290_v60 = vadd.f32 %v289_v55, %v288_v54 }
 0x165   : > { %v369_v62 = vpop.xlane.xlu1 %368 }
 0x166   : > { %v276_v61 = vadd.f32 %v275_v58, %v274_v56  ;;  %v291_v63 = vrot.slane %v290_v60, 2  ;;  %v370_v0 = vrot.slane %v369_v62, 4 }
 0x167   : > { %v382_v1 = vpop.xlane.xlu0 %381 }
 0x168   : > { %v277_v2 = vrot.slane %v276_v61, 2  ;;  %v383_v3 = vrot.slane %v382_v1, 4  ;;  %v371_v5 = vadd.f32 %v370_v0, %v369_v62  ;;  %v292_v6 = vadd.f32 %v291_v63, %v290_v60 }
 0x16a   : > { %v384_v9 = vadd.f32 %v383_v3, %v382_v1  ;;  %v278_v10 = vadd.f32 %v277_v2, %v276_v61  ;;  %v372_v11 = vrot.slane %v371_v5, 2  ;;  %v293_v12 = vrot.slane %v292_v6, 1 }
 0x16c   : > { %v385_v13 = vrot.slane %v384_v9, 2  ;;  %v279_v14 = vrot.slane %v278_v10, 1  ;;  %v373_v16 = vadd.f32 %v372_v11, %v371_v5  ;;  %v294_v17 = vadd.f32 %v293_v12, %v292_v6 }
 0x16e   : > { %v386_v19 = vadd.f32 %v385_v13, %v384_v9  ;;  %v280_v20 = vadd.f32 %v279_v14, %v278_v10  ;;  %v374_v21 = vrot.slane %v373_v16, 1 }
 0x170   : > { %564 = vpush %v280_v20  ;;  %v387_v23 = vrot.slane %v386_v19, 1  ;;  %v375_v25 = vadd.f32 %v374_v21, %v373_v16 }
 0x171   : > { %566 = vpush %v294_v17 }
 0x172   : > { %568 = vpush %v337_v22  ;;  %v388_v26 = vadd.f32 %v387_v23, %v386_v19 }
 0x173   : > { %570 = vpush %v351_v24 }
 0x174   : > { %572 = vpush %v375_v25 }
 0x175   : > { %574 = vpush %v388_v26 }
 0x1a1   : > { %s565_s21 = spop %564 }
 0x1a2   : > { %v394_v27 = vstv %s565_s21  ;;  %s567_s18 = spop %566  ;;  %s712_s21 = sshll.u32 %s803_s12, 4  ;;  %s713_s21 = int_to_ptr.vmem [resolvable:$false] %s712_s21 }
 0x1a3   : > { %v397_v28 = vstv %s567_s18  ;;  %s569_s28 = spop %568  ;;  %v395_v29 = vsel %vm393_vm0, %v394_v27, 0.0  ;;  %s714_s18 = scalar_lea.vmem %s713_s21, 256 }
 0x1a4   : > { %s571_s30 = spop %570  ;;  %v398_v30 = vsel %vm396_vm1, %v397_v28, 0.0  ;;  %p715_p7 = scmp.lt.s32.totalorder %s1025_s6, %s713_s21 }
 0x1a5   : > { %s573_s3 = spop %572  ;;  %v399_v31 = vadd.f32 %v398_v30, %v395_v29  ;;  %p716_p10 = scmp.lt.s32.totalorder %s714_s18, %s708_s8 }
 0x1a6   : > { %s377_s15 = sadd.f32 %s573_s3, %s569_s28  ;;  %s575_s26 = spop %574 }
 0x1a7   : > { %s390_s16 = sadd.f32 %s575_s26, %s571_s30  ;;  %p717_p9 = por %p716_p10, %p715_p7 }
 0x1a8   : > { %v401_v32 = vstv %s377_s15 }
 0x1a9   : > { %v402_v33 = vsel %vm400_vm2, %v401_v32, 0.0  ;;  %v405_v34 = vstv %s390_s16  ;;  %p718_p11 = pnand %p717_p9, %p711_p13 }
 0x1aa   : > { %v403_v35 = vadd.f32 %v402_v33, %v399_v31  ;;  %v406_v36 = vsel %vm404_vm3, %v405_v34, 0.0 }
 0x1ac   : > { %v407_v37 = vadd.f32 %v406_v36, %v403_v35 }
 0x1ae   : > { %412 = vst [vmem:[%s221_s27] sm:$0xff] %v407_v37 }
 0x1af   : > { %721 = shalt.err (!%p718_p11)
}
 0x1b0   : > { %s722_s4 = scalar_lea.hbm %s1023_s25, 128  ;;  %s726_s30 = scalar_lea.hbm %s1074_s2, 256 }
 0x1b1   : > { %p723_p1 = scmp.ne.s32.totalorder %s1023_s25, %s722_s4  ;;  %p727_p5 = scmp.lt.u32.totalorder %s1023_s25, %s1074_s2 }
 0x1b2   : > { %p728_p4 = scmp.lt.u32.totalorder %s726_s30, %s722_s4  ;;  %p730_p0 = scmp.lt.u32.totalorder %s722_s4, %s1023_s25 }
 0x1b3   : > { %p724_p6 = pnand %p723_p1, %p1087_p3 }
 0x1b4   : > { %p729_p8 = por %p728_p4, %p727_p5 }
 0x1b5   : > { %p725_p2 = pneg %p724_p6 }
 0x1b6   : > { %p731_p12 = por %p730_p0, %p729_p8 }
 0x1b8   : > { %p732_p13 = pnand %p731_p12, %p725_p2 }
 0x1ba   : > { %735 = shalt.err (!%p732_p13)
}
 0x1bb   : > { %580 = dma.vmem_to_hbm [thread:$0]  (%p1087_p3), %s1025_s6, 128, %s1023_s25, %s420_s7  }
 0x1bc PF: > { %s445_s26 = sand.u32 1, %s774_s9   ;;  %p1088_p7 = scmp.ne.s32.totalorder %s1080_s24, 0 }
 0x1bd   : > { %p1089_p10 = scmp.ge.s32.totalorder %s794_s14, 2  ;;  %s446_s16 = scalar_lea.sflag [#allocation6], %s445_s26 }
 0x1bf   : > { %p590_p9 = pnand %p1089_p10, %p1088_p7 }
 0x1c1   : > { %769 = dma.done.wait (!%p590_p9), %s446_s16, 128  }
 0x1c2   : > { %771 = vsyncadd (!%p590_p9), %s446_s16, 4294967168  ;;  %s21_s14 = sadd.s32 1, %s794_s14   ;;  %s1090_s9 = smov %s778_s10 }
 0x1c3   : > { %p18_p11 = scmp.ge.s32.totalorder %s21_s14, 4   ;;  %s1091_s10 = smov %s782_s11 }
 0x1c4   : > { %s1092_s11 = smov %s875_s23  ;;  %s1093_s12 = smov %s790_s13 }
 0x1c5   : > { %s1094_s13 = smov %s1096_s17  ;;  %20 = sbr.rel (!%p18_p11) target bundleno = 8 (0x8), region = 94 }
 0x1cc   :  { %451 = vsyncpa [#allocation5], 1 }
 0x1cd   :  { %453 = vsyncpa [#allocation5 + $0x1], 1 }
 0x1ce   :  { %454 = vsyncpa [#allocation8], 1 }
 0x1cf   :  { %456 = vsyncpa [#allocation8 + $0x1], 1 }
 0x1d0   :  { %457 = vsyncpa [#allocation6], 1 }
 0x1d1   :  { %459 = vsyncpa [#allocation6 + $0x1], 1 }

</bundles_post_ra>
